<compile_context>
chip_gen: v7x
topology: tpu7x:2x2x1
jax: 0.10.0
libtpu: 0.0.40
codegen_flags: <defaults>
</compile_context>

<pallas_src>
import functools

import jax
import jax.numpy as jnp
from jax import lax
from jax.experimental import pallas as pl
from jax.experimental.pallas import tpu as pltpu


def _round_up(x, m):
    return (x + m - 1) // m * m


def _gelu_exact(x):
    # PyTorch nn.GELU() default = exact erf formulation.
    return 0.5 * x * (1.0 + lax.erf(x * (1.0 / jnp.sqrt(2.0).astype(x.dtype))))


def _gelu_tanh(x):
    # tanh approximation runs on the EUP (separate VLIW slot) instead of a long
    # VPU erf polynomial; slight deviation from nn.GELU()'s exact default.
    return jax.nn.gelu(x, approximate=True)


def _vmem_capacity_bytes():
    try:
        info = pltpu.get_tpu_info()
        return int(getattr(info, "vmem_capacity_bytes", 128 << 20))
    except Exception:
        return 128 << 20


# --------------------------------------------------------------------------- #
# Kernel
# --------------------------------------------------------------------------- #
def glu_kernel(x_ref, wgv_ref, bgv_ref, wd_ref, bd_ref, o_ref, acc_ref, *,
               ti, approximate_gelu):
    j = pl.program_id(1)

    @pl.when(j == 0)
    def _():
        acc_ref[...] = jnp.zeros_like(acc_ref)

    x = x_ref[...]                                   # (tm, H), compute dtype
    # Fused gate|value up-projection: one GEMM, f32 accumulation on the MXU.
    gv = jnp.dot(x, wgv_ref[...], preferred_element_type=jnp.float32)
    gv = gv + bgv_ref[...]                           # (tm, 2*ti), f32
    g = gv[:, :ti]
    v = gv[:, ti:]
    act = _gelu_tanh if approximate_gelu else _gelu_exact
    # Elementwise in f32, collapse to one intermediate, downcast before the MXU.
    h = (act(g) * v).astype(x_ref.dtype)             # (tm, ti)
    acc_ref[...] += jnp.dot(h, wd_ref[...], preferred_element_type=jnp.float32)

    @pl.when(j == pl.num_programs(1) - 1)
    def _():
        o_ref[...] = (acc_ref[...] + bd_ref[...]).astype(o_ref.dtype)


# --------------------------------------------------------------------------- #
# One-time planning + weight preparation
# --------------------------------------------------------------------------- #
def plan_glu_tiles(hidden_dim, intermediate_dim, x_dtype, *,
                   use_bf16_compute=False, approximate_gelu=False):
    """Chip-aware tile plan. Depends only on (H, I, dtype, chip), so compute once."""
    H, I = int(hidden_dim), int(intermediate_dim)
    x_dtype = jnp.dtype(x_dtype)
    compute_dtype = (jnp.dtype(jnp.bfloat16)
                     if (use_bf16_compute and x_dtype == jnp.float32) else x_dtype)
    c_isz = compute_dtype.itemsize
    sub = 16 if c_isz == 2 else 8                    # bf16 native sublane tile is (16,128)

    vmem_cap = _vmem_capacity_bytes()
    small_vmem = vmem_cap <= (80 << 20)              # v7x-class TensorCore (64 MiB)
    if small_vmem:
        tm_target, ti_target = 384, 384
        vmem_budget = int(min(max(vmem_cap - (8 << 20), 32 << 20), 56 << 20))
    else:
        tm_target, ti_target = 640, 1024
        vmem_budget = 100 << 20
    tm_target = _round_up(tm_target, sub)

    # Resident-weights fast path: one slab covering the whole (padded) intermediate
    # dim -> weight block indices constant across the grid -> weights DMA'd once.
    ti_full = _round_up(I, 128)
    resident_est = (2 * (H * 2 * ti_full + ti_full * H) * c_isz   # double-buffered slabs
                    + 4 * tm_target * H * c_isz                   # x + out tiles (2x each)
                    + tm_target * H * 4                           # f32 accumulator
                    + tm_target * 3 * ti_full * 4)                # f32 gv / h temporaries
    if resident_est <= vmem_budget:
        ti = ti_full
    else:
        ti = min(ti_target, ti_full)
    Ip = _round_up(I, ti)
    n_i = Ip // ti

    return dict(H=H, I=I, Ip=Ip, ti=ti, n_i=n_i, sub=sub,
                tm_target=tm_target, vmem_budget=vmem_budget,
                small_vmem=small_vmem, compute_dtype=compute_dtype,
                approximate_gelu=approximate_gelu)


def prepare_glu_params(params, plan):
    """One-time fusion/padding of the GLU weights into the kernel layout."""
    wg, bg, wv, bv, wd, bd = params
    H, I, Ip, ti, n_i = plan["H"], plan["I"], plan["Ip"], plan["ti"], plan["n_i"]
    cdt = plan["compute_dtype"]
    pad_i = Ip - I

    wg_p = jnp.pad(wg, ((0, 0), (0, pad_i))).astype(cdt)
    wv_p = jnp.pad(wv, ((0, 0), (0, pad_i))).astype(cdt)
    bg_p = jnp.pad(bg, (0, pad_i)).astype(jnp.float32)
    bv_p = jnp.pad(bv, (0, pad_i)).astype(jnp.float32)
    wd_p = jnp.pad(wd, ((0, pad_i), (0, 0))).astype(cdt)

    # slab j of the fused up-projection weight is [Wg_j | Wv_j]
    wgv = jnp.concatenate([wg_p.reshape(H, n_i, ti),
                           wv_p.reshape(H, n_i, ti)], axis=-1).reshape(H, n_i * 2 * ti)
    bgv = jnp.concatenate([bg_p.reshape(n_i, ti),
                           bv_p.reshape(n_i, ti)], axis=-1).reshape(1, n_i * 2 * ti)
    bd2 = bd.reshape(1, H).astype(jnp.float32)
    return (wgv, bgv, wd_p, bd2)


# --------------------------------------------------------------------------- #
# Forward
# --------------------------------------------------------------------------- #
def glu_forward(x, prepared, plan):
    """x: [B, S, H] or [M, H]. Returns same leading shape with last dim H."""
    wgv, bgv, wd_p, bd2 = prepared
    H, Ip, ti, n_i = plan["H"], plan["Ip"], plan["ti"], plan["n_i"]
    sub, cdt = plan["sub"], plan["compute_dtype"]

    orig_shape = x.shape
    assert orig_shape[-1] == H
    out_dtype = x.dtype
    o_isz = jnp.dtype(out_dtype).itemsize
    c_isz = jnp.dtype(cdt).itemsize

    x2d = x.reshape(-1, H).astype(cdt)
    M = x2d.shape[0]

    # ---- M tile ----
    tm = min(plan["tm_target"], _round_up(M, sub))
    # dual-TensorCore chips: keep >= 2 tiles on the "parallel" M axis when possible
    if plan["small_vmem"] and M >= 2 * sub and _round_up(M, tm) // tm < 2:
        tm = _round_up((M + 1) // 2, sub)

    def vmem_estimate(tm_):
        return (2 * tm_ * H * c_isz          # x tile (double buffered)
                + 2 * H * 2 * ti * c_isz     # fused Wg|Wv column slab
                + 2 * 2 * ti * 4             # fused bias slab (f32)
                + 2 * ti * H * c_isz         # Wd row slab
                + 2 * H * 4                  # bd
                + 2 * tm_ * H * o_isz        # out tile
                + tm_ * H * 4                # f32 accumulator scratch
                + tm_ * 3 * ti * 4)          # f32 gv / h elementwise temporaries

    while vmem_estimate(tm) > plan["vmem_budget"] and tm > sub:
        tm = max(sub, _round_up(tm // 2, sub))

    Mp = _round_up(M, tm)
    n_m = Mp // tm
    if Mp != M:
        x2d = jnp.pad(x2d, ((0, Mp - M), (0, 0)))

    vmem_limit = int(min(max(vmem_estimate(tm) * 5 // 4, 32 << 20),
                         plan["vmem_budget"]))

    # ---- cost estimate reflecting the actual schedule ----
    weight_stream = 1 if n_i == 1 else n_m   # slabs re-streamed per M tile unless resident
    cost = pl.CostEstimate(
        flops=6 * Mp * H * Ip,               # 4*M*H*I up-proj + 2*M*I*H down-proj
        transcendentals=Mp * Ip,             # erf/tanh per intermediate element
        bytes_accessed=(Mp * H * c_isz
                        + weight_stream * (wgv.size + wd_p.size) * c_isz
                        + bgv.size * 4 + bd2.size * 4
                        + Mp * H * o_isz),
    )

    kernel = functools.partial(glu_kernel, ti=ti,
                               approximate_gelu=plan["approximate_gelu"])

    out = pl.pallas_call(
        kernel,
        out_shape=jax.ShapeDtypeStruct((Mp, H), out_dtype),
        grid_spec=pltpu.PrefetchScalarGridSpec(
            num_scalar_prefetch=0,
            grid=(n_m, n_i),
            in_specs=[
                pl.BlockSpec((tm, H), lambda i, j: (i, 0)),        # x row tile
                pl.BlockSpec((H, 2 * ti), lambda i, j: (0, j)),    # fused Wg|Wv column slab
                pl.BlockSpec((1, 2 * ti), lambda i, j: (0, j)),    # fused bg|bv slab (f32)
                pl.BlockSpec((ti, H), lambda i, j: (j, 0)),        # Wd row slab
                pl.BlockSpec((1, H), lambda i, j: (0, 0)),         # bd (f32)
            ],
            out_specs=pl.BlockSpec((tm, H), lambda i, j: (i, 0)),
            scratch_shapes=[pltpu.VMEM((tm, H), jnp.float32)],     # f32 output accumulator
        ),
        compiler_params=pltpu.CompilerParams(
            dimension_semantics=("parallel", "arbitrary"),
            vmem_limit_bytes=vmem_limit,
        ),
        cost_estimate=cost,
    )(x2d, wgv, bgv, wd_p, bd2)

    if Mp != M:
        out = out[:M]
    return out.reshape(orig_shape)


# --------------------------------------------------------------------------- #
# Params / reference
# --------------------------------------------------------------------------- #
def init_glu_params(key, hidden_dim, intermediate_dim, dtype=jnp.float32):
    """nn.Linear-style init; weights stored [in_features, out_features]."""
    ks = jax.random.split(key, 6)
    lim_h = 1.0 / jnp.sqrt(hidden_dim)
    lim_i = 1.0 / jnp.sqrt(intermediate_dim)
    wg = jax.random.uniform(ks[0], (hidden_dim, intermediate_dim), dtype, -lim_h, lim_h)
    bg = jax.random.uniform(ks[1], (intermediate_dim,), dtype, -lim_h, lim_h)
    wv = jax.random.uniform(ks[2], (hidden_dim, intermediate_dim), dtype, -lim_h, lim_h)
    bv = jax.random.uniform(ks[3], (intermediate_dim,), dtype, -lim_h, lim_h)
    wd = jax.random.uniform(ks[4], (intermediate_dim, hidden_dim), dtype, -lim_i, lim_i)
    bd = jax.random.uniform(ks[5], (hidden_dim,), dtype, -lim_i, lim_i)
    return (wg, bg, wv, bv, wd, bd)


def glu_reference(x, params):
    wg, bg, wv, bv, wd, bd = params
    g = x @ wg + bg
    v = x @ wv + bv
    h = _gelu_exact(g) * v
    return h @ wd + bd   # dropout p=0.0 -> identity


if __name__ == "__main__":
    batch, seq, hidden = 2, 8, 32
    intermediate = 64   # ~ 2/3 * 4 * hidden

    key = jax.random.PRNGKey(0)
    kx, kp = jax.random.split(key)
    x = jax.random.normal(kx, (batch, seq, hidden), dtype=jnp.float32)
    params = init_glu_params(kp, hidden, intermediate)

    # One-time (per model) planning + weight fusion; re-used across forward calls.
    plan = plan_glu_tiles(hidden, intermediate, x.dtype)
    prepared = prepare_glu_params(params, plan)
    prepared = jax.block_until_ready(prepared)

    out = glu_forward(x, prepared, plan)
    out = jax.block_until_ready(out)

    ref = glu_reference(x, params)
    assert out.shape == (batch, seq, hidden)
    assert jnp.allclose(out, ref, atol=1e-5, rtol=1e-5), "mismatch vs reference"

    print("KERNEL_OK")
</pallas_src>

<mosaic_0001>
module attributes {stable_mosaic.version = 11 : i64} {
  func.func @glu_kernel(%arg0: i32, %arg1: i32, %arg2: memref<16x32xf32, #tpu.memory_space<vmem>>, %arg3: memref<32x256xf32, #tpu.memory_space<vmem>>, %arg4: memref<1x256xf32, #tpu.memory_space<vmem>>, %arg5: memref<128x32xf32, #tpu.memory_space<vmem>>, %arg6: memref<1x32xf32, #tpu.memory_space<vmem>>, %arg7: memref<16x32xf32, #tpu.memory_space<vmem>>, %arg8: memref<16x32xf32, #tpu.memory_space<vmem>>) attributes {dimension_semantics = [#tpu.dimension_semantics<parallel>, #tpu.dimension_semantics<arbitrary>], iteration_bounds = array<i64: 1, 1>, scalar_prefetch = 0 : i64, scratch_operands = 1 : i64, tpu.core_type = #tpu.core_type<tc>, window_params = [{transform_indices = @transform_0, window_bounds = array<i64: 16, 32>}, {transform_indices = @transform_1, window_bounds = array<i64: 32, 256>}, {transform_indices = @transform_2, window_bounds = array<i64: 1, 256>}, {transform_indices = @transform_3, window_bounds = array<i64: 128, 32>}, {pipeline_mode = #tpu.pipeline_mode<synchronous>, transform_indices = @transform_4, window_bounds = array<i64: 1, 32>}, {transform_indices = @transform_5, window_bounds = array<i64: 16, 32>}]} {
    %c0_i32 = arith.constant 0 : i32
    %0 = arith.cmpi eq, %arg1, %c0_i32 : i32
    %1 = arith.extui %0 : i1 to i32
    %c0_i32_0 = arith.constant 0 : i32
    %2 = arith.cmpi ne, %1, %c0_i32_0 : i32
    scf.if %2 {
      %cst_19 = arith.constant 0.000000e+00 : f32
      %30 = vector.broadcast %cst_19 : f32 to vector<16x32xf32>
      %c0_20 = arith.constant 0 : index
      %c0_21 = arith.constant 0 : index
      %31 = vector.load %arg8[%c0_20, %c0_21] : memref<16x32xf32, #tpu.memory_space<vmem>>, vector<16x32xf32>
      tpu.vector_store %arg8[%c0_20, %c0_21], %30 {strides = array<i32>} : memref<16x32xf32, #tpu.memory_space<vmem>>, vector<16x32xf32>,
    } else {
    }
    %c0 = arith.constant 0 : index
    %c0_1 = arith.constant 0 : index
    %3 = vector.load %arg2[%c0, %c0_1] : memref<16x32xf32, #tpu.memory_space<vmem>>, vector<16x32xf32>
    %c0_2 = arith.constant 0 : index
    %c0_3 = arith.constant 0 : index
    %4 = vector.load %arg3[%c0_2, %c0_3] : memref<32x256xf32, #tpu.memory_space<vmem>>, vector<32x256xf32>
    %cst = arith.constant dense<0.000000e+00> : vector<16x256xf32>
    %5 = tpu.matmul %3, %4, %cst {dimension_numbers = #tpu.dot_dimension_numbers<[1], [0], [0], [1], [0, 0, 1, 1], [], []>} : vector<16x32xf32>, vector<32x256xf32>, vector<16x256xf32> -> vector<16x256xf32>
    %c0_4 = arith.constant 0 : index
    %c0_5 = arith.constant 0 : index
    %6 = vector.load %arg4[%c0_4, %c0_5] : memref<1x256xf32, #tpu.memory_space<vmem>>, vector<1x256xf32>
    %7 = vector.broadcast %6 : vector<1x256xf32> to vector<16x256xf32>
    %8 = arith.addf %5, %7 : vector<16x256xf32>
    %9 = vector.extract_strided_slice %8 {offsets = [0, 0], sizes = [16, 128], strides = [1, 1]} : vector<16x256xf32> to vector<16x128xf32>
    %10 = vector.extract_strided_slice %8 {offsets = [0, 128], sizes = [16, 128], strides = [1, 1]} : vector<16x256xf32> to vector<16x128xf32>
    %cst_6 = arith.constant 5.000000e-01 : f32
    %11 = vector.broadcast %cst_6 : f32 to vector<16x128xf32>
    %12 = arith.mulf %11, %9 : vector<16x128xf32>
    %cst_7 = arith.constant 2.000000e+00 : f32
    %13 = math.sqrt %cst_7 : f32
    %cst_8 = arith.constant 1.000000e+00 : f32
    %14 = arith.divf %cst_8, %13 : f32
    %15 = vector.broadcast %14 : f32 to vector<16x128xf32>
    %16 = arith.mulf %9, %15 : vector<16x128xf32>
    %17 = math.erf %16 : vector<16x128xf32>
    %cst_9 = arith.constant 1.000000e+00 : f32
    %18 = vector.broadcast %cst_9 : f32 to vector<16x128xf32>
    %19 = arith.addf %18, %17 : vector<16x128xf32>
    %20 = arith.mulf %12, %19 : vector<16x128xf32>
    %21 = arith.mulf %20, %10 : vector<16x128xf32>
    %c0_10 = arith.constant 0 : index
    %c0_11 = arith.constant 0 : index
    %22 = vector.load %arg8[%c0_10, %c0_11] : memref<16x32xf32, #tpu.memory_space<vmem>>, vector<16x32xf32>
    %c0_12 = arith.constant 0 : index
    %c0_13 = arith.constant 0 : index
    %23 = vector.load %arg5[%c0_12, %c0_13] : memref<128x32xf32, #tpu.memory_space<vmem>>, vector<128x32xf32>
    %cst_14 = arith.constant dense<0.000000e+00> : vector<16x32xf32>
    %24 = tpu.matmul %21, %23, %cst_14 {dimension_numbers = #tpu.dot_dimension_numbers<[1], [0], [0], [1], [0, 0, 1, 1], [], []>} : vector<16x128xf32>, vector<128x32xf32>, vector<16x32xf32> -> vector<16x32xf32>
    %25 = arith.addf %22, %24 : vector<16x32xf32>
    %c0_15 = arith.constant 0 : index
    %c0_16 = arith.constant 0 : index
    %26 = vector.load %arg8[%c0_15, %c0_16] : memref<16x32xf32, #tpu.memory_space<vmem>>, vector<16x32xf32>
    tpu.vector_store %arg8[%c0_15, %c0_16], %25 {strides = array<i32>} : memref<16x32xf32, #tpu.memory_space<vmem>>, vector<16x32xf32>,
    %c0_i32_17 = arith.constant 0 : i32
    %27 = arith.cmpi eq, %arg1, %c0_i32_17 : i32
    %28 = arith.extui %27 : i1 to i32
    %c0_i32_18 = arith.constant 0 : i32
    %29 = arith.cmpi ne, %28, %c0_i32_18 : i32
    scf.if %29 {
      %c0_19 = arith.constant 0 : index
      %c0_20 = arith.constant 0 : index
      %30 = vector.load %arg8[%c0_19, %c0_20] : memref<16x32xf32, #tpu.memory_space<vmem>>, vector<16x32xf32>
      %c0_21 = arith.constant 0 : index
      %c0_22 = arith.constant 0 : index
      %31 = vector.load %arg6[%c0_21, %c0_22] : memref<1x32xf32, #tpu.memory_space<vmem>>, vector<1x32xf32>
      %32 = vector.broadcast %31 : vector<1x32xf32> to vector<16x32xf32>
      %33 = arith.addf %30, %32 : vector<16x32xf32>
      %c0_23 = arith.constant 0 : index
      %c0_24 = arith.constant 0 : index
      %34 = vector.load %arg7[%c0_23, %c0_24] : memref<16x32xf32, #tpu.memory_space<vmem>>, vector<16x32xf32>
      tpu.vector_store %arg7[%c0_23, %c0_24], %33 {strides = array<i32>} : memref<16x32xf32, #tpu.memory_space<vmem>>, vector<16x32xf32>,
    } else {
    }
    return
  }
  func.func @transform_0(%arg0: i32, %arg1: i32) -> (i32, i32) {
    %c0_i32 = arith.constant 0 : i32
    %c0_i32_0 = arith.constant 0 : i32
    return %arg0, %c0_i32 : i32, i32
  }
  func.func @transform_1(%arg0: i32, %arg1: i32) -> (i32, i32) {
    %c0_i32 = arith.constant 0 : i32
    %c0_i32_0 = arith.constant 0 : i32
    return %c0_i32, %arg1 : i32, i32
  }
  func.func @transform_2(%arg0: i32, %arg1: i32) -> (i32, i32) {
    %c0_i32 = arith.constant 0 : i32
    %c0_i32_0 = arith.constant 0 : i32
    return %c0_i32, %arg1 : i32, i32
  }
  func.func @transform_3(%arg0: i32, %arg1: i32) -> (i32, i32) {
    %c0_i32 = arith.constant 0 : i32
    %c0_i32_0 = arith.constant 0 : i32
    return %arg1, %c0_i32 : i32, i32
  }
  func.func @transform_4(%arg0: i32, %arg1: i32) -> (i32, i32) {
    %c0_i32 = arith.constant 0 : i32
    %c0_i32_0 = arith.constant 0 : i32
    %c0_i32_1 = arith.constant 0 : i32
    return %c0_i32, %c0_i32_0 : i32, i32
  }
  func.func @transform_5(%arg0: i32, %arg1: i32) -> (i32, i32) {
    %c0_i32 = arith.constant 0 : i32
    %c0_i32_0 = arith.constant 0 : i32
    return %arg0, %c0_i32 : i32, i32
  }
}

</mosaic_0001>

<bundles_post_ra>
// kernel: tpu_custom_call.1
= control target key start
LH: loop header
LB: loop body
LE: loop exit
PB: predicated region body
PF: predicated region fallthrough
CT: control target
= control target key end

     0   :  { %vm25_vm0 = vcmask 261120   ;;  %v403_v7 = vmov 0.0   ;;  %s541_s0 = inlined_call_operand.vmem [shape: f32[16,32], index: 0, kind: input, shape index: {}]   ;;  %s542_s1 = inlined_call_operand.vmem [shape: f32[32,256], index: 1, kind: input, shape index: {}]   ;;  %s543_s2 = inlined_call_operand.vmem [shape: f32[1,256], index: 2, kind: input, shape index: {}]   ;;  %s544_s3 = inlined_call_operand.vmem [shape: f32[128,32], index: 3, kind: input, shape index: {}]   ;;  %s545_s4 = inlined_call_operand.vmem [shape: f32[1,32], index: 4, kind: input, shape index: {}]   ;;  %s546_s5 = inlined_call_operand.hbm [shape: f32[16,32], index: 5, kind: output, shape index: {}]  }
   0x1   :  { %v31_v0 = vld [vmem:[%s542_s1 + $0x8] sm:$0xff]  ;;  %v33_v1 = vld [vmem:[%s542_s1 + $0x18] sm:$0xff]  ;;  %v30_v2 = vld [vmem:[%s542_s1] sm:$0xff]  ;;  %26 = vst.msk [vmem:[#allocation2] sm:$0xff] %vm25_vm0, %v403_v7  ;;  %121 = vmatprep.mubr.f32.mxu0 %v403_v7 }
   0x2   :  { %v331_v3 = vpack.c.bf16 %v33_v1, %v31_v0  ;;  %v32_v4 = vld [vmem:[%s542_s1 + $0x10] sm:$0xff]  ;;  %v35_v5 = vld [vmem:[%s542_s1 + $0x28] sm:$0xff]  ;;  %v37_v6 = vld [vmem:[%s542_s1 + $0x38] sm:$0xff]  ;;  %27 = vst.msk [vmem:[#allocation2 + $0x8] sm:$0xff] %vm25_vm0, %v403_v7 }
   0x3   :  { %v333_v8 = vpack.c.bf16 %v32_v4, %v30_v2  ;;  %v335_v9 = vpack.c.bf16 %v37_v6, %v35_v5  ;;  %v34_v10 = vld [vmem:[%s542_s1 + $0x20] sm:$0xff]  ;;  %v36_v11 = vld [vmem:[%s542_s1 + $0x30] sm:$0xff]  ;;  %v149_v13 = vld [vmem:[%s544_s3 + $0x8] sm:$0xff] }
   0x4   :  { %332 = vmatprep.subr.bf16.mxu0 %v331_v3  ;;  %v148_v12 = vld [vmem:[%s544_s3] sm:$0xff]  ;;  %v337_v14 = vpack.c.bf16 %v36_v11, %v34_v10  ;;  %v150_v16 = vld [vmem:[%s544_s3 + $0x10] sm:$0xff]  ;;  %v151_v17 = vld [vmem:[%s544_s3 + $0x18] sm:$0xff] }
   0x5   :  { %334 = vmatpush1.bf16.msra.mxu0 %v333_v8  ;;  %v339_v15 = vpack.c.bf16 %v149_v13, %v148_v12  ;;  %v343_v18 = vpack.c.bf16 %v151_v17, %v150_v16 }
   0x6   :  { %336 = vmatprep.subr.bf16.mxu0 %v335_v9 }
   0x7   :  { %10 = vsyncpa [#allocation4], 0  ;;  %340 = vmatprep.subr.bf16.mxu1 %v339_v15  ;;  %v28_v19 = vld [vmem:[%s541_s0] sm:$0xff]  ;;  %v29_v20 = vld [vmem:[%s541_s0 + $0x8] sm:$0xff]  ;;  %v40_v39 = vlaneseq  ;;  %s404_s19 = smov [#allocation3]  }
   0x8   :  { %342 = vmatpush3.bf16.msra.mxu1 %v339_v15  ;;  %v152_v21 = vld [vmem:[%s544_s3 + $0x20] sm:$0xff]  ;;  %v153_v22 = vld [vmem:[%s544_s3 + $0x28] sm:$0xff]  ;;  %v154_v24 = vld [vmem:[%s544_s3 + $0x30] sm:$0xff]  ;;  %s264_s20 = sshll.u32 %s404_s19, 4  ;;  %s265_s20 = int_to_ptr.vmem [resolvable:$true] %s264_s20 }
   0x9   :  { %338 = vmatpush1.bf16.msra.mxu0 %v337_v14  ;;  %344 = vmatprep.subr.bf16.mxu1 %v343_v18  ;;  %v347_v23 = vpack.c.bf16 %v153_v22, %v152_v21  ;;  %v155_v25 = vld [vmem:[%s544_s3 + $0x38] sm:$0xff]  ;;  %v156_v27 = vld [vmem:[%s544_s3 + $0x40] sm:$0xff]  ;;  %v157_v28 = vld [vmem:[%s544_s3 + $0x48] sm:$0xff]  ;;  %v41_v40 = vshrl.u32 %v40_v39, 7  ;;  %s379_s21 = scalar_lea.vmem %s265_s20, 256  ;;  %p384_p1 = scmp.lt.s32.totalorder %s265_s20, %s265_s20 }
   0xa   :  { %v351_v26 = vpack.c.bf16 %v155_v25, %v154_v24  ;;  %v355_v29 = vpack.c.bf16 %v157_v28, %v156_v27  ;;  %v158_v30 = vld [vmem:[%s544_s3 + $0x50] sm:$0xff]  ;;  %v159_v31 = vld [vmem:[%s544_s3 + $0x58] sm:$0xff]  ;;  %v160_v33 = vld [vmem:[%s544_s3 + $0x60] sm:$0xff]  ;;  %p380_p0 = scmp.ne.s32.totalorder %s265_s20, %s379_s21  ;;  %p385_p2 = scmp.lt.s32.totalorder %s379_s21, %s379_s21 }
   0xb   :  { %v359_v32 = vpack.c.bf16 %v159_v31, %v158_v30  ;;  %v161_v34 = vld [vmem:[%s544_s3 + $0x68] sm:$0xff]  ;;  %v162_v36 = vld [vmem:[%s544_s3 + $0x70] sm:$0xff]  ;;  %v163_v37 = vld [vmem:[%s544_s3 + $0x78] sm:$0xff]  ;;  %v42_v41 = vsub.s32 0, %v41_v40  ;;  %v46_v52 = vsub.s32 1, %v41_v40 }
   0xc   :  { %275 = vmatmul.mubr.msk.f32.vlgmr.msra.gmra.mrb[0].mxu0 %vm25_vm0, %v28_v19  ;;  %346 = vmatpush3.bf16.msra.mxu1 %v343_v18  ;;  %v363_v35 = vpack.c.bf16 %v161_v34, %v160_v33  ;;  %v367_v38 = vpack.c.bf16 %v163_v37, %v162_v36  ;;  %v38_v42 = vld [vmem:[%s543_s2] sm:$0x3]  ;;  %v147_v2 = vld [vmem:[#allocation2 + $0x8] sm:$0xff]  ;;  %p386_p3 = por %p385_p2, %p384_p1 }
   0xd   :  { %127 = vmatprep.mubr.f32.mxu0 %v403_v7  ;;  %348 = vmatprep.subr.bf16.mxu1 %v347_v23  ;;  %v43_v43 = vrot.slane %v38_v42, %v42_v41  ;;  %v47_v53 = vrot.slane %v38_v42, %v46_v52  ;;  %v146_v3 = vld [vmem:[#allocation2] sm:$0xff] }
   0xe   :  { %v277_v8 = vld [vmem:[%s545_s4] ss:$0 sm:$0xff]  ;;  %p387_p4 = pnand %p386_p3, %p380_p0 }
  0x10   :  { %276 = vmatmul.mubr.msk.f32.gmra.mrb[2].mxu0 %vm25_vm0, %v29_v20  ;;  %350 = vmatpush3.bf16.msra.mxu1 %v347_v23 }
  0x11   :  { %352 = vmatprep.subr.bf16.mxu1 %v351_v26 }
  0x14   :  { %354 = vmatpush3.bf16.msra.mxu1 %v351_v26 }
  0x15   :  { %356 = vmatprep.subr.bf16.mxu1 %v355_v29 }
  0x18   :  { %358 = vmatpush3.bf16.msra.mxu1 %v355_v29 }
  0x19   :  { %360 = vmatprep.subr.bf16.mxu1 %v359_v32 }
  0x1c   :  { %362 = vmatpush3.bf16.msra.mxu1 %v359_v32 }
  0x1d   :  { %364 = vmatprep.subr.bf16.mxu1 %v363_v35 }
  0x20   :  { %366 = vmatpush3.bf16.msra.mxu1 %v363_v35 }
  0x21   :  { %368 = vmatprep.subr.bf16.mxu1 %v367_v38 }
  0x24   :  { %370 = vmatpush3.bf16.msra.mxu1 %v367_v38 }
  0xdf   :  { %v123_v44 = vpop.f32.mrb[0].mxu0 }
  0xe0   :  { %v124_v45 = vadd.f32 %v123_v44, %v43_v43  ;;  %v125_v46 = vpop.f32.mrb[1].mxu0 }
  0xe1   :  { %v126_v57 = vadd.f32 %v125_v46, %v47_v53 }
  0xe2   :  { %v136_v47 = vmul.f32 0.70710677, %v124_v45  ;;  %v134_v55 = vmul.f32 0.5, %v124_v45 }
  0xe3   :  { %v129_v48 = vpop.f32.mrb[2].mxu0 }
  0xe4   :  { %375 = verf.f32 %v136_v47  ;;  %v130_v49 = vadd.f32 %v129_v48, %v43_v43  ;;  %v131_v50 = vpop.f32.mrb[3].mxu0 }
  0xe5   :  { %v132_v63 = vadd.f32 %v131_v50, %v47_v53 }
  0xe6   :  { %v137_v51 = vmul.f32 0.70710677, %v130_v49  ;;  %v135_v60 = vmul.f32 0.5, %v130_v49 }
  0xe8   :  { %377 = verf.f32 %v137_v51 }
  0xee   :  { %v376_v54 = vpop.eup %375 }
  0xef   :  { %v140_v56 = vadd.f32 1.0, %v376_v54 }
  0xf1   :  { %v142_v58 = vmul.f32 %v140_v56, %v134_v55 }
  0xf2   :  { %v378_v59 = vpop.eup %377 }
  0xf3   :  { %v141_v61 = vadd.f32 1.0, %v378_v59  ;;  %v144_v62 = vmul.f32 %v142_v58, %v126_v57 }
  0xf5   :  { %v143_v0 = vmul.f32 %v141_v61, %v135_v60  ;;  %328 = vmatprep.mubr.f32.mxu1 %v144_v62 }
  0xf7   :  { %v145_v1 = vmul.f32 %v143_v0, %v132_v63 }
  0xf9   :  { %329 = vmatmul.mubr.f32.vlgmr.msra.gmra.mrb[0].mxu1 %v145_v1 }
 0x1cc   :  { %v330_v4 = vpop.f32.mrb[0].mxu1 }
 0x1cd   :  { %v240_v5 = vadd.f32 %v330_v4, %v147_v2  ;;  %v230_v6 = vpop.f32.mrb[1].mxu1 }
 0x1ce   :  { %v239_v7 = vadd.f32 %v230_v6, %v146_v3 }
 0x1cf   :  { %242 = vst.msk [vmem:[#allocation2 + $0x8] sm:$0xff] %vm25_vm0, %v240_v5 }
 0x1d0   :  { %241 = vst.msk [vmem:[#allocation2] sm:$0xff] %vm25_vm0, %v239_v7 }
 0x1d6   :  { %v247_v9 = vld [vmem:[#allocation2 + $0x8] sm:$0xff] }
 0x1d7   :  { %v246_v10 = vld [vmem:[#allocation2] sm:$0xff]  ;;  %v256_v11 = vadd.f32 %v277_v8, %v247_v9 }
 0x1d8   :  { %v255_v12 = vadd.f32 %v277_v8, %v246_v10 }
 0x1d9   :  { %258 = vst.msk [vmem:[#allocation3 + $0x8] sm:$0xff] %vm25_vm0, %v256_v11 }
 0x1da   :  { %257 = vst.msk [vmem:[#allocation3] sm:$0xff] %vm25_vm0, %v255_v12 }
 0x1db   :  { %390 = shalt.err (!%p387_p4)
}
 0x1dc   :  { %s391_s23 = scalar_lea.hbm %s546_s5, 256 }
 0x1dd   :  { %p392_p5 = scmp.ne.s32.totalorder %s546_s5, %s391_s23  ;;  %p395_p6 = scmp.lt.u32.totalorder %s391_s23, %s546_s5 }
 0x1df   :  { %p397_p7 = pnand %p395_p6, %p392_p5 }
 0x1e1   :  { %400 = shalt.err (!%p397_p7)
}
 0x1e2   :  { %s405_s0 = smov 128   ;;  %s406_s28 = smov 8  }
 0x1e3   :  { %270 = dma.vmem_to_hbm [thread:$0]  %s265_s20, 256, %s546_s5, [#allocation4], %s405_s0, %s405_s0, %s406_s28  }
 0x1e4   :  { %401 = dma.done.wait [#allocation4], 256  }
 0x1e5   :  { %402 = vsyncadd [#allocation4], 4294967040 }
 0x1e6   :  { %274 = vsyncpa [#allocation4], 1 }

</bundles_post_ra>
